<compile_context>
chip_gen: v7x
topology: tpu7x:2x2x1
jax: 0.10.0
libtpu: 0.0.40
codegen_flags: <defaults>
</compile_context>

<pallas_src>
import functools

import jax
import jax.numpy as jnp
from jax import lax
from jax.experimental import pallas as pl
from jax.experimental.pallas import tpu as pltpu


def _round_up(v, m):
    return ((v + m - 1) // m) * m


def bottleneck_kernel(x_ref, mask_ref, w1_ref, s1_ref, b1_ref,
                      w2_ref, s2_ref, b2_ref,
                      w3_ref, s3_ref, b3_ref,
                      o_ref, pad_ref, im2col_ref, *, width, pad):
    """One batch element per grid step; HW on lanes, channels on sublanes."""
    x = x_ref[0]                                      # (Cin, HW) f32
    hw = x.shape[1]
    cbp = w1_ref.shape[0]                             # padded bottleneck width

    # Zero the borders of the padded scratch (implements the vertical padding
    # of the 3x3 conv).  Kept per-step for megacore safety (see header note);
    # cost is two bf16 vreg stores.
    pad_ref[:, :pad] = jnp.zeros((cbp, pad), pad_ref.dtype)
    pad_ref[:, pad + hw:] = jnp.zeros((cbp, pad), pad_ref.dtype)

    # ---- conv1 (1x1, no bias) + bn1 + relu : channel matmul on the MXU ----
    h1 = jnp.dot(w1_ref[...], x.astype(jnp.bfloat16),
                 preferred_element_type=jnp.float32)              # (Cbp, HW) f32
    h1 = jnp.maximum(h1 * s1_ref[...] + b1_ref[...], 0.0)
    # Single f32->bf16 cast of the conv2 input, written once into the padded
    # scratch; every tap below is a static-offset bf16 slice load.
    pad_ref[:, pad:pad + hw] = h1.astype(jnp.bfloat16)

    # ---- conv2 (3x3, stride=1, padding=1) + bn2 + relu ----
    m_left = mask_ref[0:1, :]        # 1.0 where the dw = -1 source column exists
    m_right = mask_ref[1:2, :]       # 1.0 where the dw = +1 source column exists

    k = 0
    for dh in (-1, 0, 1):
        for dw in (-1, 0, 1):
            off = dh * width + dw
            tap = pad_ref[:, pad + off:pad + off + hw]            # (Cbp, HW) bf16
            if dw == -1:
                tap = tap * m_left                                # exact: x*1 / x*0
            elif dw == 1:
                tap = tap * m_right
            im2col_ref[k * cbp:(k + 1) * cbp, :] = tap            # aligned bf16 store
            k += 1

    # Single fused im2col matmul for all 9 taps (K = 9*Cbp), bf16 operands.
    h2 = jnp.dot(w2_ref[...], im2col_ref[...],
                 preferred_element_type=jnp.float32)              # (Cbp, HW) f32
    h2 = jnp.maximum(h2 * s2_ref[...] + b2_ref[...], 0.0)

    # ---- conv3 (1x1) + bn3 + identity residual (= x) + relu ----
    h3 = jnp.dot(w3_ref[...], h2.astype(jnp.bfloat16),
                 preferred_element_type=jnp.float32)              # (Cout, HW) f32
    h3 = h3 * s3_ref[...] + b3_ref[...]
    o_ref[0] = jnp.maximum(h3 + x, 0.0).astype(o_ref.dtype)


def bottleneck_forward(x_nchw, params):
    """Wrapper: NCHW -> (B, C, H*W) -> Pallas kernel -> NCHW (reshape only)."""
    B, cin, H, W = x_nchw.shape
    cb = params["w1"].shape[1]
    cout = params["w3"].shape[1]
    # Identity residual path (forward(x, residual=None)) needs matching shapes.
    assert cin == cout, "identity residual requires fan_in == fan_out"
    # TODO(synk): stride>1 / dilation>1 / rfp_forward (rfp_conv) paths not implemented.

    hw = H * W
    pad = max(128, _round_up(W + 1, 128))     # lane-aligned zero border, >= W+1
    cbp = _round_up(cb, 16)                   # bf16 sublane packing (16 rows / vreg)

    x = x_nchw.reshape(B, cin, hw)

    f32, bf16 = jnp.float32, jnp.bfloat16

    # Weights arranged for "weight @ activations" (channels-major), padded to
    # Cbp with zeros, fed to the MXU as bf16; BN scale/bias stay f32 columns.
    w1 = jnp.zeros((cbp, cin), bf16).at[:cb, :].set(
        jnp.transpose(params["w1"]).astype(bf16))                      # (Cbp, Cin)
    w2_hwio = jnp.zeros((3, 3, cbp, cbp), f32).at[:, :, :cb, :cb].set(params["w2"])
    w2 = jnp.transpose(w2_hwio.reshape(9 * cbp, cbp)).astype(bf16)     # (Cbp, 9*Cbp)
    w3 = jnp.zeros((cout, cbp), bf16).at[:, :cb].set(
        jnp.transpose(params["w3"]).astype(bf16))                      # (Cout, Cbp)

    def pad_col(v, n):
        return jnp.zeros((n, 1), f32).at[:v.shape[0], 0].set(v)

    s1 = pad_col(params["s1"], cbp); b1 = pad_col(params["b1"], cbp)
    s2 = pad_col(params["s2"], cbp); b2 = pad_col(params["b2"], cbp)
    s3 = params["s3"].reshape(cout, 1); b3 = params["b3"].reshape(cout, 1)

    # Horizontal-wrap masks for dw = -1 / +1, precomputed once host-side.
    col = jnp.arange(hw, dtype=jnp.int32) % W
    masks = jnp.stack([(col >= 1), (col < W - 1)]).astype(bf16)        # (2, HW)

    kernel = functools.partial(bottleneck_kernel, width=W, pad=pad)

    def rep(shape):
        nd = len(shape)
        return pl.BlockSpec(shape, lambda b, nd=nd: (0,) * nd)

    flops = 2 * B * hw * (cin * cbp + 9 * cbp * cbp + cbp * cout)
    bytes_accessed = (4 * B * hw * (cin + cout)                        # x in / out (f32)
                      + 2 * (w1.size + w2.size + w3.size + masks.size)
                      + 4 * (4 * cbp + 2 * cout))                      # BN scale/bias

    out = pl.pallas_call(
        kernel,
        out_shape=jax.ShapeDtypeStruct((B, cout, hw), jnp.float32),
        grid_spec=pltpu.PrefetchScalarGridSpec(
            num_scalar_prefetch=0,
            grid=(B,),
            in_specs=[
                pl.BlockSpec((1, cin, hw), lambda b: (b, 0, 0)),       # x
                rep((2, hw)),                                          # dw masks
                rep((cbp, cin)),                                       # w1
                rep((cbp, 1)), rep((cbp, 1)),                          # bn1 scale/bias
                rep((cbp, 9 * cbp)),                                   # w2 (im2col layout)
                rep((cbp, 1)), rep((cbp, 1)),                          # bn2 scale/bias
                rep((cout, cbp)),                                      # w3
                rep((cout, 1)), rep((cout, 1)),                        # bn3 scale/bias
            ],
            out_specs=pl.BlockSpec((1, cout, hw), lambda b: (b, 0, 0)),
            scratch_shapes=[
                pltpu.VMEM((cbp, hw + 2 * pad), jnp.bfloat16),         # padded bn1 output
                pltpu.VMEM((9 * cbp, hw), jnp.bfloat16),               # im2col matrix
            ],
        ),
        compiler_params=pltpu.CompilerParams(dimension_semantics=("parallel",)),
        cost_estimate=pl.CostEstimate(flops=flops, transcendentals=0,
                                      bytes_accessed=bytes_accessed),
    )(x, masks, w1, s1, b1, w2, s2, b2, w3, s3, b3)

    return out.reshape(B, cout, H, W)


def make_params(key, fan_in, fan_out):
    """Deterministic synthetic parameters (Bottleneck.expansion == 2)."""
    cb = fan_out // 2
    keys = jax.random.split(key, 15)
    eps = 1e-5

    def bn(kg, kb, km, kv, c):
        gamma = 1.0 + 0.1 * jax.random.normal(kg, (c,), jnp.float32)
        beta = 0.1 * jax.random.normal(kb, (c,), jnp.float32)
        mean = 0.1 * jax.random.normal(km, (c,), jnp.float32)
        var = jax.random.uniform(kv, (c,), jnp.float32, 0.5, 1.5)
        scale = gamma / jnp.sqrt(var + eps)      # fold eval-mode BN
        bias = beta - mean * scale
        return scale, bias

    w1 = 0.2 * jax.random.normal(keys[0], (fan_in, cb), jnp.float32)      # 1x1
    w2 = 0.2 * jax.random.normal(keys[1], (3, 3, cb, cb), jnp.float32)    # HWIO
    w3 = 0.2 * jax.random.normal(keys[2], (cb, fan_out), jnp.float32)     # 1x1
    s1, b1 = bn(*keys[3:7], cb)
    s2, b2 = bn(*keys[7:11], cb)
    s3, b3 = bn(*keys[11:15], fan_out)
    return dict(w1=w1, w2=w2, w3=w3, s1=s1, b1=b1, s2=s2, b2=b2, s3=s3, b3=b3)


def bottleneck_reference(x_nchw, p, matmul_dtype=jnp.float32):
    """Pure-JAX reference (same eval-mode BN folding).  matmul_dtype=bfloat16
    mirrors the kernel's bf16-operand / f32-accumulate matmuls."""
    md = matmul_dtype
    x = jnp.transpose(x_nchw, (0, 2, 3, 1))          # NHWC
    h = jnp.einsum("bhwc,cd->bhwd", x.astype(md), p["w1"].astype(md),
                   preferred_element_type=jnp.float32)
    h = jnp.maximum(h * p["s1"] + p["b1"], 0.0)
    h = lax.conv_general_dilated(h.astype(md), p["w2"].astype(md), (1, 1),
                                 ((1, 1), (1, 1)),
                                 dimension_numbers=("NHWC", "HWIO", "NHWC"),
                                 preferred_element_type=jnp.float32)
    h = jnp.maximum(h * p["s2"] + p["b2"], 0.0)
    h = jnp.einsum("bhwc,cd->bhwd", h.astype(md), p["w3"].astype(md),
                   preferred_element_type=jnp.float32)
    h = h * p["s3"] + p["b3"]
    h = jnp.maximum(h + x, 0.0)
    return jnp.transpose(h, (0, 3, 1, 2))


if __name__ == "__main__":
    key = jax.random.PRNGKey(0)
    kx, kp = jax.random.split(key)

    # fan_in == fan_out so the identity residual (residual=None -> x) is valid.
    B, C, H, W = 2, 8, 16, 16
    x = jax.random.normal(kx, (B, C, H, W), jnp.float32)
    params = make_params(kp, C, C)

    out = jax.block_until_ready(bottleneck_forward(x, params))

    # Tight check against a precision-matched (bf16-operand) reference, plus a
    # loose sanity check against the pure-f32 reference.
    ref_match = bottleneck_reference(x, params, matmul_dtype=jnp.bfloat16)
    ref_f32 = bottleneck_reference(x, params, matmul_dtype=jnp.float32)
    assert out.shape == ref_f32.shape == (B, C, H, W)
    err_match = float(jnp.max(jnp.abs(out - ref_match)))
    err_f32 = float(jnp.max(jnp.abs(out - ref_f32)))
    assert jnp.allclose(out, ref_match, atol=2e-3, rtol=2e-3), err_match
    assert jnp.allclose(out, ref_f32, atol=1e-1, rtol=1e-1), err_f32
    print("KERNEL_OK")
</pallas_src>

<mosaic_0001>
module attributes {stable_mosaic.version = 11 : i64} {
  func.func @bottleneck_kernel(%arg0: i32, %arg1: memref<1x8x256xf32, #tpu.memory_space<vmem>>, %arg2: memref<2x256xbf16, #tpu.memory_space<vmem>>, %arg3: memref<16x8xbf16, #tpu.memory_space<vmem>>, %arg4: memref<16x1xf32, #tpu.memory_space<vmem>>, %arg5: memref<16x1xf32, #tpu.memory_space<vmem>>, %arg6: memref<16x144xbf16, #tpu.memory_space<vmem>>, %arg7: memref<16x1xf32, #tpu.memory_space<vmem>>, %arg8: memref<16x1xf32, #tpu.memory_space<vmem>>, %arg9: memref<8x16xbf16, #tpu.memory_space<vmem>>, %arg10: memref<8x1xf32, #tpu.memory_space<vmem>>, %arg11: memref<8x1xf32, #tpu.memory_space<vmem>>, %arg12: memref<1x8x256xf32, #tpu.memory_space<vmem>>, %arg13: memref<16x512xbf16, #tpu.memory_space<vmem>>, %arg14: memref<144x256xbf16, #tpu.memory_space<vmem>>) attributes {dimension_semantics = [#tpu.dimension_semantics<parallel>], iteration_bounds = array<i64: 2>, scalar_prefetch = 0 : i64, scratch_operands = 2 : i64, tpu.core_type = #tpu.core_type<tc>, window_params = [{transform_indices = @transform_0, window_bounds = array<i64: 1, 8, 256>}, {pipeline_mode = #tpu.pipeline_mode<synchronous>, transform_indices = @transform_1, window_bounds = array<i64: 2, 256>}, {pipeline_mode = #tpu.pipeline_mode<synchronous>, transform_indices = @transform_2, window_bounds = array<i64: 16, 8>}, {pipeline_mode = #tpu.pipeline_mode<synchronous>, transform_indices = @transform_3, window_bounds = array<i64: 16, 1>}, {pipeline_mode = #tpu.pipeline_mode<synchronous>, transform_indices = @transform_4, window_bounds = array<i64: 16, 1>}, {pipeline_mode = #tpu.pipeline_mode<synchronous>, transform_indices = @transform_5, window_bounds = array<i64: 16, 144>}, {pipeline_mode = #tpu.pipeline_mode<synchronous>, transform_indices = @transform_6, window_bounds = array<i64: 16, 1>}, {pipeline_mode = #tpu.pipeline_mode<synchronous>, transform_indices = @transform_7, window_bounds = array<i64: 16, 1>}, {pipeline_mode = #tpu.pipeline_mode<synchronous>, transform_indices = @transform_8, window_bounds = array<i64: 8, 16>}, {pipeline_mode = #tpu.pipeline_mode<synchronous>, transform_indices = @transform_9, window_bounds = array<i64: 8, 1>}, {pipeline_mode = #tpu.pipeline_mode<synchronous>, transform_indices = @transform_10, window_bounds = array<i64: 8, 1>}, {transform_indices = @transform_11, window_bounds = array<i64: 1, 8, 256>}]} {
    %c0 = arith.constant 0 : index
    %c0_0 = arith.constant 0 : index
    %c0_1 = arith.constant 0 : index
    %0 = vector.load %arg1[%c0, %c0_0, %c0_1] : memref<1x8x256xf32, #tpu.memory_space<vmem>>, vector<1x8x256xf32>
    %1 = vector.shape_cast %0 : vector<1x8x256xf32> to vector<8x256xf32>
    %cst = arith.constant 0.000000e+00 : bf16
    %2 = vector.broadcast %cst : bf16 to vector<16x128xbf16>
    %c0_2 = arith.constant 0 : index
    %c0_3 = arith.constant 0 : index
    %3 = vector.load %arg13[%c0_2, %c0_3] : memref<16x512xbf16, #tpu.memory_space<vmem>>, vector<16x128xbf16>
    tpu.vector_store %arg13[%c0_2, %c0_3], %2 {strides = array<i32>} : memref<16x512xbf16, #tpu.memory_space<vmem>>, vector<16x128xbf16>,
    %cst_4 = arith.constant 0.000000e+00 : bf16
    %4 = vector.broadcast %cst_4 : bf16 to vector<16x128xbf16>
    %c0_5 = arith.constant 0 : index
    %c384 = arith.constant 384 : index
    %5 = vector.load %arg13[%c0_5, %c384] : memref<16x512xbf16, #tpu.memory_space<vmem>>, vector<16x128xbf16>
    tpu.vector_store %arg13[%c0_5, %c384], %4 {strides = array<i32>} : memref<16x512xbf16, #tpu.memory_space<vmem>>, vector<16x128xbf16>,
    %c0_6 = arith.constant 0 : index
    %c0_7 = arith.constant 0 : index
    %6 = vector.load %arg3[%c0_6, %c0_7] : memref<16x8xbf16, #tpu.memory_space<vmem>>, vector<16x8xbf16>
    %7 = arith.truncf %1 : vector<8x256xf32> to vector<8x256xbf16>
    %cst_8 = arith.constant dense<0.000000e+00> : vector<16x256xf32>
    %8 = tpu.matmul %6, %7, %cst_8 {dimension_numbers = #tpu.dot_dimension_numbers<[1], [0], [0], [1], [0, 0, 1, 1], [], []>} : vector<16x8xbf16>, vector<8x256xbf16>, vector<16x256xf32> -> vector<16x256xf32>
    %c0_9 = arith.constant 0 : index
    %c0_10 = arith.constant 0 : index
    %9 = vector.load %arg4[%c0_9, %c0_10] : memref<16x1xf32, #tpu.memory_space<vmem>>, vector<16x1xf32>
    %10 = vector.broadcast %9 : vector<16x1xf32> to vector<16x256xf32>
    %11 = arith.mulf %8, %10 : vector<16x256xf32>
    %c0_11 = arith.constant 0 : index
    %c0_12 = arith.constant 0 : index
    %12 = vector.load %arg5[%c0_11, %c0_12] : memref<16x1xf32, #tpu.memory_space<vmem>>, vector<16x1xf32>
    %13 = vector.broadcast %12 : vector<16x1xf32> to vector<16x256xf32>
    %14 = arith.addf %11, %13 : vector<16x256xf32>
    %cst_13 = arith.constant 0.000000e+00 : f32
    %15 = vector.broadcast %cst_13 : f32 to vector<16x256xf32>
    %16 = arith.maximumf %14, %15 : vector<16x256xf32>
    %17 = arith.truncf %16 : vector<16x256xf32> to vector<16x256xbf16>
    %c0_14 = arith.constant 0 : index
    %c128 = arith.constant 128 : index
    %18 = vector.load %arg13[%c0_14, %c128] : memref<16x512xbf16, #tpu.memory_space<vmem>>, vector<16x256xbf16>
    tpu.vector_store %arg13[%c0_14, %c128], %17 {strides = array<i32>} : memref<16x512xbf16, #tpu.memory_space<vmem>>, vector<16x256xbf16>,
    %c0_15 = arith.constant 0 : index
    %c0_16 = arith.constant 0 : index
    %19 = vector.load %arg2[%c0_15, %c0_16] : memref<2x256xbf16, #tpu.memory_space<vmem>>, vector<1x256xbf16>
    %c1 = arith.constant 1 : index
    %c0_17 = arith.constant 0 : index
    %20 = vector.load %arg2[%c1, %c0_17] : memref<2x256xbf16, #tpu.memory_space<vmem>>, vector<1x256xbf16>
    %c0_18 = arith.constant 0 : index
    %c111 = arith.constant 111 : index
    %21 = vector.load %arg13[%c0_18, %c111] : memref<16x512xbf16, #tpu.memory_space<vmem>>, vector<16x256xbf16>
    %22 = vector.broadcast %19 : vector<1x256xbf16> to vector<16x256xbf16>
    %23 = arith.mulf %21, %22 : vector<16x256xbf16>
    %c0_19 = arith.constant 0 : index
    %c0_20 = arith.constant 0 : index
    %24 = vector.load %arg14[%c0_19, %c0_20] : memref<144x256xbf16, #tpu.memory_space<vmem>>, vector<16x256xbf16>
    tpu.vector_store %arg14[%c0_19, %c0_20], %23 {strides = array<i32>} : memref<144x256xbf16, #tpu.memory_space<vmem>>, vector<16x256xbf16>,
    %c0_21 = arith.constant 0 : index
    %c112 = arith.constant 112 : index
    %25 = vector.load %arg13[%c0_21, %c112] : memref<16x512xbf16, #tpu.memory_space<vmem>>, vector<16x256xbf16>
    %c16 = arith.constant 16 : index
    %c0_22 = arith.constant 0 : index
    %26 = vector.load %arg14[%c16, %c0_22] : memref<144x256xbf16, #tpu.memory_space<vmem>>, vector<16x256xbf16>
    tpu.vector_store %arg14[%c16, %c0_22], %25 {strides = array<i32>} : memref<144x256xbf16, #tpu.memory_space<vmem>>, vector<16x256xbf16>,
    %c0_23 = arith.constant 0 : index
    %c113 = arith.constant 113 : index
    %27 = vector.load %arg13[%c0_23, %c113] : memref<16x512xbf16, #tpu.memory_space<vmem>>, vector<16x256xbf16>
    %28 = vector.broadcast %20 : vector<1x256xbf16> to vector<16x256xbf16>
    %29 = arith.mulf %27, %28 : vector<16x256xbf16>
    %c32 = arith.constant 32 : index
    %c0_24 = arith.constant 0 : index
    %30 = vector.load %arg14[%c32, %c0_24] : memref<144x256xbf16, #tpu.memory_space<vmem>>, vector<16x256xbf16>
    tpu.vector_store %arg14[%c32, %c0_24], %29 {strides = array<i32>} : memref<144x256xbf16, #tpu.memory_space<vmem>>, vector<16x256xbf16>,
    %c0_25 = arith.constant 0 : index
    %c127 = arith.constant 127 : index
    %31 = vector.load %arg13[%c0_25, %c127] : memref<16x512xbf16, #tpu.memory_space<vmem>>, vector<16x256xbf16>
    %32 = vector.broadcast %19 : vector<1x256xbf16> to vector<16x256xbf16>
    %33 = arith.mulf %31, %32 : vector<16x256xbf16>
    %c48 = arith.constant 48 : index
    %c0_26 = arith.constant 0 : index
    %34 = vector.load %arg14[%c48, %c0_26] : memref<144x256xbf16, #tpu.memory_space<vmem>>, vector<16x256xbf16>
    tpu.vector_store %arg14[%c48, %c0_26], %33 {strides = array<i32>} : memref<144x256xbf16, #tpu.memory_space<vmem>>, vector<16x256xbf16>,
    %c0_27 = arith.constant 0 : index
    %c128_28 = arith.constant 128 : index
    %35 = vector.load %arg13[%c0_27, %c128_28] : memref<16x512xbf16, #tpu.memory_space<vmem>>, vector<16x256xbf16>
    %c64 = arith.constant 64 : index
    %c0_29 = arith.constant 0 : index
    %36 = vector.load %arg14[%c64, %c0_29] : memref<144x256xbf16, #tpu.memory_space<vmem>>, vector<16x256xbf16>
    tpu.vector_store %arg14[%c64, %c0_29], %35 {strides = array<i32>} : memref<144x256xbf16, #tpu.memory_space<vmem>>, vector<16x256xbf16>,
    %c0_30 = arith.constant 0 : index
    %c129 = arith.constant 129 : index
    %37 = vector.load %arg13[%c0_30, %c129] : memref<16x512xbf16, #tpu.memory_space<vmem>>, vector<16x256xbf16>
    %38 = vector.broadcast %20 : vector<1x256xbf16> to vector<16x256xbf16>
    %39 = arith.mulf %37, %38 : vector<16x256xbf16>
    %c80 = arith.constant 80 : index
    %c0_31 = arith.constant 0 : index
    %40 = vector.load %arg14[%c80, %c0_31] : memref<144x256xbf16, #tpu.memory_space<vmem>>, vector<16x256xbf16>
    tpu.vector_store %arg14[%c80, %c0_31], %39 {strides = array<i32>} : memref<144x256xbf16, #tpu.memory_space<vmem>>, vector<16x256xbf16>,
    %c0_32 = arith.constant 0 : index
    %c143 = arith.constant 143 : index
    %41 = vector.load %arg13[%c0_32, %c143] : memref<16x512xbf16, #tpu.memory_space<vmem>>, vector<16x256xbf16>
    %42 = vector.broadcast %19 : vector<1x256xbf16> to vector<16x256xbf16>
    %43 = arith.mulf %41, %42 : vector<16x256xbf16>
    %c96 = arith.constant 96 : index
    %c0_33 = arith.constant 0 : index
    %44 = vector.load %arg14[%c96, %c0_33] : memref<144x256xbf16, #tpu.memory_space<vmem>>, vector<16x256xbf16>
    tpu.vector_store %arg14[%c96, %c0_33], %43 {strides = array<i32>} : memref<144x256xbf16, #tpu.memory_space<vmem>>, vector<16x256xbf16>,
    %c0_34 = arith.constant 0 : index
    %c144 = arith.constant 144 : index
    %45 = vector.load %arg13[%c0_34, %c144] : memref<16x512xbf16, #tpu.memory_space<vmem>>, vector<16x256xbf16>
    %c112_35 = arith.constant 112 : index
    %c0_36 = arith.constant 0 : index
    %46 = vector.load %arg14[%c112_35, %c0_36] : memref<144x256xbf16, #tpu.memory_space<vmem>>, vector<16x256xbf16>
    tpu.vector_store %arg14[%c112_35, %c0_36], %45 {strides = array<i32>} : memref<144x256xbf16, #tpu.memory_space<vmem>>, vector<16x256xbf16>,
    %c0_37 = arith.constant 0 : index
    %c145 = arith.constant 145 : index
    %47 = vector.load %arg13[%c0_37, %c145] : memref<16x512xbf16, #tpu.memory_space<vmem>>, vector<16x256xbf16>
    %48 = vector.broadcast %20 : vector<1x256xbf16> to vector<16x256xbf16>
    %49 = arith.mulf %47, %48 : vector<16x256xbf16>
    %c128_38 = arith.constant 128 : index
    %c0_39 = arith.constant 0 : index
    %50 = vector.load %arg14[%c128_38, %c0_39] : memref<144x256xbf16, #tpu.memory_space<vmem>>, vector<16x256xbf16>
    tpu.vector_store %arg14[%c128_38, %c0_39], %49 {strides = array<i32>} : memref<144x256xbf16, #tpu.memory_space<vmem>>, vector<16x256xbf16>,
    %c0_40 = arith.constant 0 : index
    %c0_41 = arith.constant 0 : index
    %51 = vector.load %arg6[%c0_40, %c0_41] : memref<16x144xbf16, #tpu.memory_space<vmem>>, vector<16x144xbf16>
    %c0_42 = arith.constant 0 : index
    %c0_43 = arith.constant 0 : index
    %52 = vector.load %arg14[%c0_42, %c0_43] : memref<144x256xbf16, #tpu.memory_space<vmem>>, vector<144x256xbf16>
    %cst_44 = arith.constant dense<0.000000e+00> : vector<16x256xf32>
    %53 = tpu.matmul %51, %52, %cst_44 {dimension_numbers = #tpu.dot_dimension_numbers<[1], [0], [0], [1], [0, 0, 1, 1], [], []>} : vector<16x144xbf16>, vector<144x256xbf16>, vector<16x256xf32> -> vector<16x256xf32>
    %c0_45 = arith.constant 0 : index
    %c0_46 = arith.constant 0 : index
    %54 = vector.load %arg7[%c0_45, %c0_46] : memref<16x1xf32, #tpu.memory_space<vmem>>, vector<16x1xf32>
    %55 = vector.broadcast %54 : vector<16x1xf32> to vector<16x256xf32>
    %56 = arith.mulf %53, %55 : vector<16x256xf32>
    %c0_47 = arith.constant 0 : index
    %c0_48 = arith.constant 0 : index
    %57 = vector.load %arg8[%c0_47, %c0_48] : memref<16x1xf32, #tpu.memory_space<vmem>>, vector<16x1xf32>
    %58 = vector.broadcast %57 : vector<16x1xf32> to vector<16x256xf32>
    %59 = arith.addf %56, %58 : vector<16x256xf32>
    %cst_49 = arith.constant 0.000000e+00 : f32
    %60 = vector.broadcast %cst_49 : f32 to vector<16x256xf32>
    %61 = arith.maximumf %59, %60 : vector<16x256xf32>
    %c0_50 = arith.constant 0 : index
    %c0_51 = arith.constant 0 : index
    %62 = vector.load %arg9[%c0_50, %c0_51] : memref<8x16xbf16, #tpu.memory_space<vmem>>, vector<8x16xbf16>
    %63 = arith.truncf %61 : vector<16x256xf32> to vector<16x256xbf16>
    %cst_52 = arith.constant dense<0.000000e+00> : vector<8x256xf32>
    %64 = tpu.matmul %62, %63, %cst_52 {dimension_numbers = #tpu.dot_dimension_numbers<[1], [0], [0], [1], [0, 0, 1, 1], [], []>} : vector<8x16xbf16>, vector<16x256xbf16>, vector<8x256xf32> -> vector<8x256xf32>
    %c0_53 = arith.constant 0 : index
    %c0_54 = arith.constant 0 : index
    %65 = vector.load %arg10[%c0_53, %c0_54] : memref<8x1xf32, #tpu.memory_space<vmem>>, vector<8x1xf32>
    %66 = vector.broadcast %65 : vector<8x1xf32> to vector<8x256xf32>
    %67 = arith.mulf %64, %66 : vector<8x256xf32>
    %c0_55 = arith.constant 0 : index
    %c0_56 = arith.constant 0 : index
    %68 = vector.load %arg11[%c0_55, %c0_56] : memref<8x1xf32, #tpu.memory_space<vmem>>, vector<8x1xf32>
    %69 = vector.broadcast %68 : vector<8x1xf32> to vector<8x256xf32>
    %70 = arith.addf %67, %69 : vector<8x256xf32>
    %71 = arith.addf %70, %1 : vector<8x256xf32>
    %cst_57 = arith.constant 0.000000e+00 : f32
    %72 = vector.broadcast %cst_57 : f32 to vector<8x256xf32>
    %73 = arith.maximumf %71, %72 : vector<8x256xf32>
    %c0_58 = arith.constant 0 : index
    %c0_59 = arith.constant 0 : index
    %c0_60 = arith.constant 0 : index
    %74 = vector.load %arg12[%c0_58, %c0_59, %c0_60] : memref<1x8x256xf32, #tpu.memory_space<vmem>>, vector<1x8x256xf32>
    %75 = vector.shape_cast %74 : vector<1x8x256xf32> to vector<8x256xf32>
    %76 = vector.shape_cast %73 : vector<8x256xf32> to vector<1x8x256xf32>
    tpu.vector_store %arg12[%c0_58, %c0_59, %c0_60], %76 {strides = array<i32>} : memref<1x8x256xf32, #tpu.memory_space<vmem>>, vector<1x8x256xf32>,
    return
  }
  func.func @transform_0(%arg0: i32) -> (i32, i32, i32) {
    %c0_i32 = arith.constant 0 : i32
    %c0_i32_0 = arith.constant 0 : i32
    %c0_i32_1 = arith.constant 0 : i32
    return %arg0, %c0_i32, %c0_i32_0 : i32, i32, i32
  }
  func.func @transform_1(%arg0: i32) -> (i32, i32) {
    %c0_i32 = arith.constant 0 : i32
    %c0_i32_0 = arith.constant 0 : i32
    %c0_i32_1 = arith.constant 0 : i32
    return %c0_i32, %c0_i32_0 : i32, i32
  }
  func.func @transform_2(%arg0: i32) -> (i32, i32) {
    %c0_i32 = arith.constant 0 : i32
    %c0_i32_0 = arith.constant 0 : i32
    %c0_i32_1 = arith.constant 0 : i32
    return %c0_i32, %c0_i32_0 : i32, i32
  }
  func.func @transform_3(%arg0: i32) -> (i32, i32) {
    %c0_i32 = arith.constant 0 : i32
    %c0_i32_0 = arith.constant 0 : i32
    %c0_i32_1 = arith.constant 0 : i32
    return %c0_i32, %c0_i32_0 : i32, i32
  }
  func.func @transform_4(%arg0: i32) -> (i32, i32) {
    %c0_i32 = arith.constant 0 : i32
    %c0_i32_0 = arith.constant 0 : i32
    %c0_i32_1 = arith.constant 0 : i32
    return %c0_i32, %c0_i32_0 : i32, i32
  }
  func.func @transform_5(%arg0: i32) -> (i32, i32) {
    %c0_i32 = arith.constant 0 : i32
    %c0_i32_0 = arith.constant 0 : i32
    %c0_i32_1 = arith.constant 0 : i32
    return %c0_i32, %c0_i32_0 : i32, i32
  }
  func.func @transform_6(%arg0: i32) -> (i32, i32) {
    %c0_i32 = arith.constant 0 : i32
    %c0_i32_0 = arith.constant 0 : i32
    %c0_i32_1 = arith.constant 0 : i32
    return %c0_i32, %c0_i32_0 : i32, i32
  }
  func.func @transform_7(%arg0: i32) -> (i32, i32) {
    %c0_i32 = arith.constant 0 : i32
    %c0_i32_0 = arith.constant 0 : i32
    %c0_i32_1 = arith.constant 0 : i32
    return %c0_i32, %c0_i32_0 : i32, i32
  }
  func.func @transform_8(%arg0: i32) -> (i32, i32) {
    %c0_i32 = arith.constant 0 : i32
    %c0_i32_0 = arith.constant 0 : i32
    %c0_i32_1 = arith.constant 0 : i32
    return %c0_i32, %c0_i32_0 : i32, i32
  }
  func.func @transform_9(%arg0: i32) -> (i32, i32) {
    %c0_i32 = arith.constant 0 : i32
    %c0_i32_0 = arith.constant 0 : i32
    %c0_i32_1 = arith.constant 0 : i32
    return %c0_i32, %c0_i32_0 : i32, i32
  }
  func.func @transform_10(%arg0: i32) -> (i32, i32) {
    %c0_i32 = arith.constant 0 : i32
    %c0_i32_0 = arith.constant 0 : i32
    %c0_i32_1 = arith.constant 0 : i32
    return %c0_i32, %c0_i32_0 : i32, i32
  }
  func.func @transform_11(%arg0: i32) -> (i32, i32, i32) {
    %c0_i32 = arith.constant 0 : i32
    %c0_i32_0 = arith.constant 0 : i32
    %c0_i32_1 = arith.constant 0 : i32
    return %arg0, %c0_i32, %c0_i32_0 : i32, i32, i32
  }
}

</mosaic_0001>

<bundles_post_ra>
// kernel: tpu_custom_call.1
= control target key start
LH: loop header
LB: loop body
LE: loop exit
PB: predicated region body
PF: predicated region fallthrough
CT: control target
= control target key end

     0   :  { %16 = vsyncpa [#allocation5], 0  ;;  %s1476_s0 = inlined_call_operand.vmem [shape: f32[2,8,256], index: 0, kind: input, shape index: {}]   ;;  %s1477_s1 = inlined_call_operand.vmem [shape: bf16[2,256], index: 1, kind: input, shape index: {}]   ;;  %s1478_s2 = inlined_call_operand.vmem [shape: bf16[16,8], index: 2, kind: input, shape index: {}]   ;;  %s1479_s3 = inlined_call_operand.vmem [shape: f32[16,1], index: 3, kind: input, shape index: {}]   ;;  %s1480_s4 = inlined_call_operand.vmem [shape: f32[16,1], index: 4, kind: input, shape index: {}]   ;;  %s1481_s5 = inlined_call_operand.vmem [shape: bf16[16,144], index: 5, kind: input, shape index: {}]   ;;  %s1482_s6 = inlined_call_operand.vmem [shape: f32[16,1], index: 6, kind: input, shape index: {}]   ;;  %s1483_s7 = inlined_call_operand.vmem [shape: f32[16,1], index: 7, kind: input, shape index: {}]   ;;  %s1484_s8 = inlined_call_operand.vmem [shape: bf16[8,16], index: 8, kind: input, shape index: {}]   ;;  %s1485_s9 = inlined_call_operand.vmem [shape: f32[8,1], index: 9, kind: input, shape index: {}]   ;;  %s1486_s10 = inlined_call_operand.vmem [shape: f32[8,1], index: 10, kind: input, shape index: {}]   ;;  %s1487_s11 = inlined_call_operand.hbm [shape: f32[2,8,256], index: 11, kind: output, shape index: {}]  }
   0x1   :  { %18 = vsyncpa [#allocation5 + $0x1], 0  ;;  %s1238_s17 = smov 0   ;;  %s1240_s18 = smov 0  }
   0x2   :  { %s1242_s19 = smov 0   ;;  %s1244_s20 = smov 0  }
   0x3 LB: > { %s1259_s21 = sadd.s32 4294967295, %s1165_s20   ;;  %s1026_s22 = sadd.s32 4294967294, %s1165_s20   ;;  %s1165_s20 = sphi %s1244_s20, %s1495_s20   ;;  %s1161_s19 = sphi %s1242_s19, %s1494_s19   ;;  %s1157_s18 = sphi %s1240_s18, %s1493_s18   ;;  %s1153_s17 = sphi %s1238_s17, %s1492_s17  }
   0x4   : > { %s1263_s23 = sadd.s32 1, %s1165_s20   ;;  %s267_s24 = sadd.s32 1, %s1161_s19 }
   0x5   : > { %s264_s25 = ssub.s32 %s1165_s20, %s1263_s23  ;;  %p277_p0 = scmp.ne.s32.totalorder %s1161_s19, %s1157_s18 }
   0x6   : > { %p265_p1 = scmp.eq.s32.totalorder %s264_s25, 0  ;;  %p278_p2 = scmp.eq.s32.totalorder %s1259_s21, 1 }
   0x7   : > { %p283_p3 = scmp.ne.s32.totalorder %s1157_s18, %s1153_s17  ;;  %p284_p4 = scmp.eq.s32.totalorder %s1026_s22, 1 }
   0x8   : > { %s1274_s26 = scalar_select %p265_p1, %s1161_s19, %s267_s24  }
   0x9   : > { %p1276_p5 = por %p278_p2, %p277_p0  ;;  %p1280_p6 = por %p284_p4, %p283_p3 }
   0xa   : > { %1488 = sst [smem:[#allocation7_spill]] %s1274_s26  ;;  %p1029_p7 = scmp.ge.s32.totalorder %s1165_s20, 1 }
   0xb   : > { %p340_p8 = scmp.lt.s32.totalorder %s1165_s20, 3 }
   0xd   : > { %p341_p9 = pnand %p1029_p7, %p340_p8 }
   0xe   : > { %p380_p10 = scmp.lt.s32.totalorder (!%p341_p9), %s1259_s21, 1  ;;  %v509_v0 = vlaneseq (!%p341_p9)  ;;  %v1167_v1 = vmov (!%p341_p9), 0   ;;  %v469_v2 = vld [vmem:[%s1480_s4] sm:$0xff] (!%p341_p9)  ;;  %v470_v4 = vld [vmem:[%s1480_s4 + $0x8] sm:$0xff] (!%p341_p9)  ;;  %v1168_v6 = vmov (!%p341_p9), 1966171168  }
   0xf   : > { %344 = sbr.rel (%p341_p9) target bundleno = 876 (0x36c), region = 64  ;;  %442 = vmatprep.mubr.bf16.mxu0 (!%p341_p9), %v1167_v1  ;;  %1098 = vset.pattern.permute.xlu1 (!%p341_p9), %v1167_v1  ;;  %v453_v3 = vld [vmem:[%s1479_s3] sm:$0xff] (!%p341_p9)  ;;  %v507_v7 = vunpack.c.l.s4 (!%p341_p9), %v1168_v6  ;;  %v454_v9 = vld [vmem:[%s1479_s3 + $0x8] sm:$0xff] (!%p341_p9)  ;;  %vm403_vm0 = vcmask (!%p341_p9), 1043456   ;;  %vm399_vm1 = vcmask (!%p341_p9), 64512   ;;  %s1170_s16 = smov (!%p341_p9), 113  }
  0x10   : > { %1097 = vset.pattern.permute.xlu0 (!%p341_p9), %v1167_v1  ;;  %473 = vperm.xlu1 (!%p341_p9), %1098, %v469_v2   ;;  %v1036_v5 = vld.sshfl [vmem:[%s1477_s1] sm:$0x11 pattern:$0x75316420] (!%p341_p9)  ;;  %v510_v8 = vshrl.u32 (!%p341_p9), %v509_v0, 7  ;;  %s1171_s22 = smov (!%p341_p9), 127  }
  0x11   : > { %457 = vperm.xlu0 (!%p341_p9), %1097, %v453_v3   ;;  %v505_v10 = vcombine.high (!%p341_p9), %v1036_v5, %v1036_v5  ;;  %v508_v11 = vunpack.c.0.s8 (!%p341_p9), %v507_v7  ;;  %v1099_v18 = vld [vmem:[%s1478_s2] sm:$0xff] (!%p341_p9)   ;;  %s1172_s24 = smov (!%p341_p9), 1   ;;  %s1174_s29 = smov (!%p341_p9), 17   ;;  %vm540_vm2 = vcmask (!%p341_p9), 908288   ;;  %vm637_vm3 = vcmask (!%p341_p9), 1039360  }
  0x12   : > { %v525_v20 = vsub.s32 (!%p341_p9), 0, %v510_v8  ;;  %s1175_s30 = smov (!%p341_p9), 16   ;;  %vm606_vm4 = vcmask (!%p341_p9), 924672   ;;  %vm654_vm5 = vcmask (!%p341_p9), 7168   ;;  %vm623_vm6 = vcmask (!%p341_p9), 121856   ;;  %s1047_s12 = sshll.u32 (!%p341_p9), %s1259_s21, 8 }
  0x13   : > { %v511_v16 = vsub.s32 (!%p341_p9), %v508_v11, %v510_v8  ;;  %vm557_vm7 = vcmask (!%p341_p9), 138240   ;;  %vm576_vm8 = vcmask (!%p341_p9), 130048   ;;  %vm735_vm9 = vcmask (!%p341_p9), 916480  }
  0x14   : > { %478 = vperm.xlu1 (!%p341_p9), %1098, %v470_v4  }
  0x15   : > { %462 = vperm.xlu0 (!%p341_p9), %1097, %v454_v9   ;;  %v519_v19 = vrot.slane (!%p341_p9), %v505_v10, %v511_v16  ;;  %v512_v21 = vrot.slane (!%p341_p9), %v1036_v5, %v511_v16 }
  0x16   : > { %s381_s14 = scalar_select %p380_p10, %s1259_s21, 1 }
  0x17   : > { %v528_v22 = vpack.i.b16 %v519_v19, %v519_v19  ;;  %v521_v23 = vpack.i.b16 %v512_v21, %v512_v21  ;;  %v593_v24 = vshrl.u32 %v519_v19, 16  ;;  %v586_v25 = vshrl.u32 %v512_v21, 16 }
  0x18   : > { %s1046_s25 = sshll.u32 %s381_s14, 4  ;;  %s1176_s14 = smov 112  }
  0x19   : > { %s384_s26 = scalar_lea.vmem %s1476_s0, %s1046_s25  ;;  %v533_v26 = vrot.slane %v528_v22, %v525_v20  ;;  %v526_v27 = vrot.slane %v521_v23, %v525_v20  ;;  %v594_v28 = vpack.i.b16 %v593_v24, %v593_v24  ;;  %v587_v29 = vpack.i.b16 %v586_v25, %v586_v25  ;;  %s1173_s25 = smov 15   ;;  %v1102_v25 = vld [vmem:[%s1481_s5 + $0x4] ss:$8 sps:$4 sm:$0xff]  }
  0x1a   : > { %v1309_v12 = vld [vmem:[%s384_s26 + $0x8] sm:$0xff]  ;;  %v1311_v13 = vld [vmem:[%s384_s26] sm:$0xff]  ;;  %s1169_s26 = smov 111   ;;  %1039 = vmatprep.mubr.msk.bf16.mxu1 %vm576_vm8, %v1102_v25 }
  0x1b   : > { %v393_v14 = vpack.c.bf16 %v1309_v12, %v1309_v12  ;;  %v392_v15 = vpack.c.bf16 %v1311_v13, %v1311_v13  ;;  %538 = vrot.lane.b32.xlu1 %v533_v26, %s1169_s26  ;;  %536 = vrot.lane.b32.xlu0 %v526_v27, %s1169_s26  ;;  %v599_v30 = vrot.slane %v594_v28, %v525_v20 }
  0x1c   : > { %v592_v31 = vrot.slane %v587_v29, %v525_v20 }
  0x1d   : > { %1034 = vmatprep.subr.msk.bf16.mxu0 %vm403_vm0, %v393_v14  ;;  %v405_v17 = vsel %vm403_vm0, %v392_v15, 0 }
  0x1e   : > { %411 = vmatpush1.bf16.msra.mxu0 %v405_v17 }
  0x1f   : > { %604 = vrot.lane.b32.xlu1 %v599_v30, %s1170_s16  ;;  %602 = vrot.lane.b32.xlu0 %v592_v31, %s1170_s16 }
  0x21   : > { %1035 = vmatmul.mubr.msk.bf16.vlgmr.msra.gmra.mrb[0].mxu0 %vm399_vm1, %v1099_v18 }
  0x22   : > { %921 = vmatprep.mubr.bf16.mxu0 %v1167_v1 }
  0x23   : > { %635 = vrot.lane.b32.xlu1 %v533_v26, %s1171_s22  ;;  %633 = vrot.lane.b32.xlu0 %v526_v27, %s1171_s22 }
  0x27   : > { %670 = vrot.lane.b32.xlu1 %v599_v30, %s1172_s24  ;;  %668 = vrot.lane.b32.xlu0 %v592_v31, %s1172_s24 }
  0x2b   : > { %699 = vrot.lane.b32.xlu1 %v533_v26, %s1173_s25  ;;  %697 = vrot.lane.b32.xlu0 %v526_v27, %s1173_s25 }
  0x2f   : > { %747 = vrot.lane.b32.xlu1 %v599_v30, %s1174_s29  ;;  %745 = vrot.lane.b32.xlu0 %v592_v31, %s1174_s29  ;;  %v847_v30 = vld [vmem:[%s1482_s6] sm:$0xff] }
  0x30   : > { %v863_v31 = vld [vmem:[%s1483_s7] sm:$0xff] }
  0x33   : > { %570 = vrot.lane.b32.xlu1 %v1167_v1, %s1175_s30 }
  0x8f   : > { %v474_v38 = vpop.permute.xlu1 %473 }
  0x90   : > { %v458_v32 = vpop.permute.xlu0 %457 }
  0x93   : > { %v479_v39 = vpop.permute.xlu1 %478 }
  0x94   : > { %v463_v33 = vpop.permute.xlu0 %462 }
  0x97   : > { %v539_v41 = vpop.permute.xlu1 %538 }
  0x98   : > { %v537_v34 = vpop.permute.xlu0 %536 }
  0x99   : > { %v545_v35 = vmul.bf16 0, %v537_v34  ;;  %v541_v61 = vsel %vm540_vm2, %v537_v34, %v539_v41  ;;  %v938_v34 = vld [vmem:[%s1486_s10] sm:$0xff] }
  0x9b   : > { %551 = vrot.lane.b32.xlu0 %v545_v35, %s1174_s29  ;;  %v605_v53 = vpop.permute.xlu1 %604 }
  0x9c   : > { %v603_v36 = vpop.permute.xlu0 %602 }
  0x9d   : > { %v611_v37 = vmul.bf16 0, %v603_v36  ;;  %v607_v3 = vsel %vm606_vm4, %v603_v36, %v605_v53 }
  0x9f   : > { %617 = vrot.lane.b32.xlu0 %v611_v37, %s1173_s25  ;;  %v636_v62 = vpop.permute.xlu1 %635 }
  0xa0   : > { %v634_v63 = vpop.permute.xlu0 %633 }
  0xa1   : > { %v638_v0 = vsel %vm637_vm3, %v634_v63, %v636_v62  ;;  %v642_v10 = vmul.bf16 0, %v634_v63 }
  0xa3   : > { %v671_v6 = vpop.permute.xlu1 %670 }
  0xa4   : > { %v669_v7 = vpop.permute.xlu0 %668  ;;  %v678_v14 = vmul.bf16 0, %v671_v6 }
  0xa5   : > { %v672_v17 = vsel %vm654_vm5, %v669_v7, %v671_v6 }
  0xa7   : > { %v700_v15 = vpop.permute.xlu1 %699 }
  0xa8   : > { %v707_v16 = vmul.bf16 0, %v700_v15  ;;  %v698_v18 = vpop.permute.xlu0 %697 }
  0xa9   : > { %v701_v20 = vsel %vm623_vm6, %v698_v18, %v700_v15 }
  0xab   : > { %v748_v23 = vpop.permute.xlu1 %747 }
  0xac   : > { %v746_v24 = vpop.permute.xlu0 %745  ;;  %v755_v28 = vmul.bf16 0, %v748_v23 }
  0xad   : > { %v749_v26 = vsel %vm557_vm7, %v746_v24, %v748_v23 }
  0xaf   : > { %v571_v36 = vpop.permute.xlu1 %570 }
  0xf4   : > { %v444_v40 = vpop.f32.mrb[0].mxu0 }
  0xf5   : > { %v465_v42 = vmul.f32 %v458_v32, %v444_v40  ;;  %v446_v43 = vpop.f32.mrb[1].mxu0 }
  0xf6   : > { %v466_v44 = vmul.f32 %v458_v32, %v446_v43  ;;  %v448_v45 = vpop.f32.mrb[2].mxu0  ;;  %v864_v32 = vld [vmem:[%s1483_s7 + $0x8] sm:$0xff] }
  0xf7   : > { %v481_v46 = vadd.f32 %v474_v38, %v465_v42  ;;  %v467_v47 = vmul.f32 %v463_v33, %v448_v45  ;;  %v450_v48 = vpop.f32.mrb[3].mxu0 }
  0xf8   : > { %v482_v49 = vadd.f32 %v474_v38, %v466_v44  ;;  %v468_v50 = vmul.f32 %v463_v33, %v450_v48  ;;  %v930_v33 = vld [vmem:[%s1485_s9] sm:$0xff] }
  0xf9   : > { %v483_v51 = vadd.f32 %v479_v39, %v467_v47  ;;  %v485_v54 = vmax.f32 %v481_v46, 0.0 }
  0xfa   : > { %v484_v52 = vadd.f32 %v479_v39, %v468_v50  ;;  %v486_v56 = vmax.f32 %v482_v49, 0.0 }
  0xfb   : > { %v487_v55 = vmax.f32 %v483_v51, 0.0 }
  0xfc   : > { %v488_v57 = vmax.f32 %v484_v52, 0.0 }
  0xfd   : > { %v1337_v58 = vpack.c.bf16 %v487_v55, %v485_v54 }
  0xfe   : > { %v1339_v59 = vpack.c.bf16 %v488_v57, %v486_v56 }
  0xff   : > { %572 = vrot.lane.b32.xlu1 %v1337_v58, %s1175_s30  ;;  %v546_v2 = vmul.bf16 %v541_v61, %v1337_v58  ;;  %v643_v4 = vmul.bf16 %v638_v0, %v1337_v58  ;;  %v612_v5 = vmul.bf16 %v607_v3, %v1337_v58  ;;  %v676_v9 = vmul.bf16 %v669_v7, %v1337_v58 }
 0x100   : > { %574 = vrot.lane.b32.xlu0 %v1339_v59, %s1175_s30  ;;  %v547_v60 = vmul.bf16 %v539_v41, %v1339_v59  ;;  %v613_v8 = vmul.bf16 %v605_v53, %v1339_v59  ;;  %v644_v11 = vmul.bf16 %v636_v62, %v1339_v59  ;;  %v705_v19 = vmul.bf16 %v698_v18, %v1337_v58 }
 0x101   : > { %v677_v21 = vmul.bf16 %v672_v17, %v1339_v59  ;;  %v706_v22 = vmul.bf16 %v701_v20, %v1339_v59  ;;  %v754_v27 = vmul.bf16 %v749_v26, %v1339_v59  ;;  %v753_v29 = vmul.bf16 %v746_v24, %v1337_v58 }
 0x103   : > { %555 = vrot.lane.b32.xlu1 %v547_v60, %s1174_s29 }
 0x104   : > { %553 = vrot.lane.b32.xlu0 %v546_v2, %s1174_s29  ;;  %s377_s29 = sand.u32 1, %s1157_s18  }
 0x105   : > { %s1030_s30 = sshll.u32 %s377_s29, 4 }
 0x106   : > { %s379_s13 = scalar_lea.vmem [#allocation4], %s1030_s30 }
 0x107   : > { %650 = vrot.lane.b32.xlu1 %v643_v4, %s1172_s24 }
 0x108   : > { %619 = vrot.lane.b32.xlu0 %v612_v5, %s1173_s25 }
 0x10b   : > { %621 = vrot.lane.b32.xlu1 %v613_v8, %s1173_s25 }
 0x10c   : > { %682 = vrot.lane.b32.xlu0 %v676_v9, %s1171_s22 }
 0x10d   : > { %v552_v35 = vpop.permute.xlu0 %551 }
 0x10f   : > { %648 = vrot.lane.b32.xlu1 %v642_v10, %s1172_s24 }
 0x110   : > { %652 = vrot.lane.b32.xlu0 %v644_v11, %s1172_s24  ;;  %s1177_s24 = smov [#allocation4]  }
 0x111   : > { %v618_v37 = vpop.permute.xlu0 %617  ;;  %s1107_s25 = sshll.u32 %s1177_s24, 4  ;;  %s1108_s25 = int_to_ptr.vmem [resolvable:$false] %s1107_s25 }
 0x112   : > { %s1109_s30 = scalar_lea.vmem %s1108_s25, 512 }
 0x113   : > { %686 = vrot.lane.b32.xlu1 %v678_v14, %s1171_s22  ;;  %v1100_v14 = vld [vmem:[%s1481_s5] ss:$8 sps:$4 sm:$0xff]  }
 0x114   : > { %715 = vrot.lane.b32.xlu0 %v707_v16, %s1170_s16 }
 0x117   : > { %711 = vrot.lane.b32.xlu1 %v705_v19, %s1170_s16 }
 0x118   : > { %684 = vrot.lane.b32.xlu0 %v677_v21, %s1171_s22  ;;  %s953_s22 = scalar_lea.sflag [#allocation5], %s377_s29 }
 0x11b   : > { %713 = vrot.lane.b32.xlu1 %v706_v22, %s1170_s16  ;;  %s1434_s16 = scalar_lea.hbm %s1487_s11, %s1047_s12 }
 0x11c   : > { %731 = vrot.lane.b32.xlu0 %v1339_v59, %s1176_s14 }
 0x11f   : > { %733 = vrot.lane.b32.xlu1 %v1167_v1, %s1176_s14  ;;  %v848_v1 = vld [vmem:[%s1482_s6 + $0x8] sm:$0xff] }
 0x120   : > { %729 = vrot.lane.b32.xlu0 %v1337_v58, %s1176_s14  ;;  %s967_s14 = sshll.u32 %s379_s13, 4  ;;  %s1436_s14 = int_to_ptr.vmem [resolvable:$true] %s967_s14 }
 0x121   : > { %s1103_s21 = scalar_lea.vmem %s1436_s14, 256  ;;  %p1110_p0 = scmp.lt.s32.totalorder %s1436_s14, %s1108_s25 }
 0x122   : > { %p1104_p11 = scmp.ne.s32.totalorder %s1436_s14, %s1103_s21  ;;  %p1111_p1 = scmp.lt.s32.totalorder %s1109_s30, %s1103_s21 }
 0x123   : > { %761 = vrot.lane.b32.xlu1 %v754_v27, %s1169_s26 }
 0x124   : > { %763 = vrot.lane.b32.xlu0 %v755_v28, %s1169_s26  ;;  %p1105_p12 = pnand %p1104_p11, %p1276_p5  ;;  %p1112_p2 = por %p1111_p1, %p1110_p0 }
 0x126   : > { %p1106_p13 = pneg %p1105_p12 }
 0x127   : > { %759 = vrot.lane.b32.xlu1 %v753_v29, %s1169_s26 }
 0x128   : > { %851 = vperm.xlu0 %1097, %v847_v30   ;;  %p1113_p3 = pnand %p1112_p2, %p1106_p13 }
 0x12b   : > { %856 = vperm.xlu1 %1098, %v848_v1  }
 0x12c   : > { %867 = vperm.xlu0 %1097, %v863_v31  }
 0x12f   : > { %872 = vperm.xlu1 %1098, %v864_v32  }
 0x130   : > { %933 = vperm.xlu0 %1097, %v930_v33  }
 0x133   : > { %941 = vperm.xlu1 %1098, %v938_v34  }
 0x171   : > { %v573_v38 = vpop.permute.xlu1 %572 }
 0x172   : > { %v575_v39 = vpop.permute.xlu0 %574  ;;  %v577_v47 = vsel %vm576_vm8, %v571_v36, %v573_v38  ;;  %v883_v36 = vld [vmem:[%s1484_s8] sm:$0xf] }
 0x173   : > { %v578_v45 = vsel %vm576_vm8, %v573_v38, %v575_v39 }
 0x175   : > { %v556_v40 = vpop.permute.xlu1 %555 }
 0x176   : > { %v554_v41 = vpop.permute.xlu0 %553 }
 0x177   : > { %v559_v42 = vsel %vm557_vm7, %v554_v41, %v556_v40  ;;  %v558_v43 = vsel %vm557_vm7, %v552_v35, %v554_v41 }
 0x178   : > { %804 = vmatprep.subr.bf16.mxu1 %v559_v42 }
 0x179   : > { %805 = vmatpush1.bf16.msra.mxu1 %v558_v43  ;;  %v651_v44 = vpop.permute.xlu1 %650 }
 0x17a   : > { %v620_v46 = vpop.permute.xlu0 %619  ;;  %806 = vmatprep.subr.bf16.mxu1 %v578_v45 }
 0x17b   : > { %v624_v51 = vsel %vm623_vm6, %v618_v37, %v620_v46 }
 0x17d   : > { %807 = vmatpush1.bf16.msra.mxu1 %v577_v47  ;;  %v622_v48 = vpop.permute.xlu1 %621 }
 0x17e   : > { %v683_v49 = vpop.permute.xlu0 %682  ;;  %v625_v50 = vsel %vm623_vm6, %v620_v46, %v622_v48 }
 0x17f   : > { %808 = vmatprep.subr.bf16.mxu1 %v625_v50 }
 0x181   : > { %809 = vmatpush1.bf16.msra.mxu1 %v624_v51  ;;  %v649_v52 = vpop.permute.xlu1 %648 }
 0x182   : > { %v653_v53 = vpop.permute.xlu0 %652  ;;  %v655_v55 = vsel %vm654_vm5, %v649_v52, %v651_v44 }
 0x183   : > { %v656_v54 = vsel %vm654_vm5, %v651_v44, %v653_v53 }
 0x184   : > { %810 = vmatprep.subr.bf16.mxu1 %v656_v54 }
 0x185   : > { %811 = vmatpush1.bf16.msra.mxu1 %v655_v55  ;;  %v687_v56 = vpop.permute.xlu1 %686 }
 0x186   : > { %v716_v57 = vpop.permute.xlu0 %715  ;;  %812 = vmatprep.subr.bf16.mxu1 %v1339_v59 }
 0x189   : > { %813 = vmatpush1.bf16.msra.mxu1 %v1337_v58  ;;  %v712_v60 = vpop.permute.xlu1 %711 }
 0x18a   : > { %v685_v61 = vpop.permute.xlu0 %684 }
 0x18b   : > { %v689_v62 = vsel %vm637_vm3, %v685_v61, %v687_v56  ;;  %v688_v63 = vsel %vm637_vm3, %v683_v49, %v685_v61 }
 0x18c   : > { %814 = vmatprep.subr.bf16.mxu1 %v689_v62 }
 0x18d   : > { %815 = vmatpush1.bf16.msra.mxu1 %v688_v63  ;;  %v714_v0 = vpop.permute.xlu1 %713 }
 0x18e   : > { %v732_v2 = vpop.permute.xlu0 %731  ;;  %v718_v3 = vsel %vm606_vm4, %v714_v0, %v716_v57  ;;  %v717_v4 = vsel %vm606_vm4, %v712_v60, %v714_v0 }
 0x18f   : > { %816 = vmatprep.subr.bf16.mxu1 %v718_v3 }
 0x191   : > { %817 = vmatpush1.bf16.msra.mxu1 %v717_v4  ;;  %v734_v59 = vpop.permute.xlu1 %733 }
 0x192   : > { %v730_v5 = vpop.permute.xlu0 %729  ;;  %v737_v58 = vsel %vm735_vm9, %v732_v2, %v734_v59 }
 0x193   : > { %818 = vmatprep.subr.bf16.mxu1 %v737_v58  ;;  %v736_v6 = vsel %vm735_vm9, %v730_v5, %v732_v2 }
 0x195   : > { %819 = vmatpush1.bf16.msra.mxu1 %v736_v6  ;;  %v762_v7 = vpop.permute.xlu1 %761 }
 0x196   : > { %v764_v8 = vpop.permute.xlu0 %763 }
 0x197   : > { %v766_v9 = vsel %vm540_vm2, %v762_v7, %v764_v8 }
 0x198   : > { %820 = vmatprep.subr.bf16.mxu1 %v766_v9 }
 0x199   : > { %v760_v10 = vpop.permute.xlu1 %759 }
 0x19a   : > { %v765_v11 = vsel %vm540_vm2, %v760_v10, %v762_v7 }
 0x19b   : > { %821 = vmatpush1.bf16.msra.mxu1 %v765_v11 }
 0x19e   : > { %837 = vmatmul.mubr.bf16.vlgmr.msra.gmra.mrb[0].mxu1 %v1100_v14 }
 0x1a7   : > { %v852_v15 = vpop.permute.xlu0 %851 }
 0x1aa   : > { %v857_v16 = vpop.permute.xlu1 %856 }
 0x1ab   : > { %v868_v20 = vpop.permute.xlu0 %867 }
 0x1ae   : > { %v873_v26 = vpop.permute.xlu1 %872 }
 0x1af   : > { %v934_v37 = vpop.permute.xlu0 %933 }
 0x1b2   : > { %v942_v41 = vpop.permute.xlu1 %941 }
 0x271   : > { %v838_v17 = vpop.f32.mrb[0].mxu1 }
 0x272   : > { %v859_v18 = vmul.f32 %v852_v15, %v838_v17  ;;  %v840_v19 = vpop.f32.mrb[1].mxu1 }
 0x273   : > { %v860_v21 = vmul.f32 %v852_v15, %v840_v19  ;;  %v842_v22 = vpop.f32.mrb[2].mxu1 }
 0x274   : > { %v875_v23 = vadd.f32 %v868_v20, %v859_v18  ;;  %v861_v24 = vmul.f32 %v857_v16, %v842_v22  ;;  %v844_v25 = vpop.f32.mrb[3].mxu1 }
 0x275   : > { %v876_v27 = vadd.f32 %v868_v20, %v860_v21  ;;  %v862_v28 = vmul.f32 %v857_v16, %v844_v25 }
 0x276   : > { %v877_v29 = vadd.f32 %v873_v26, %v861_v24  ;;  %v879_v1 = vmax.f32 %v875_v23, 0.0 }
 0x277   : > { %v878_v30 = vadd.f32 %v873_v26, %v862_v28  ;;  %v880_v32 = vmax.f32 %v876_v27, 0.0 }
 0x278   : > { %v881_v31 = vmax.f32 %v877_v29, 0.0 }
 0x279   : > { %v882_v33 = vmax.f32 %v878_v30, 0.0 }
 0x27a   : > { %v884_v34 = vpack.c.bf16 %v881_v31, %v879_v1 }
 0x27b   : > { %v885_v35 = vpack.c.bf16 %v882_v33, %v880_v32 }
 0x27d   : > { %889 = vmatprep.subr.bf16.mxu0 %v885_v35 }
 0x27e   : > { %890 = vmatpush1.bf16.msra.mxu0 %v884_v34 }
 0x281   : > { %1040 = vmatmul.mubr.msk.bf16.vlgmr.msra.gmra.mrb[4].mxu0 %vm576_vm8, %v883_v36 }
 0x354   : > { %v923_v38 = vpop.f32.mrb[4].mxu0 }
 0x355   : > { %v936_v39 = vmul.f32 %v934_v37, %v923_v38  ;;  %v925_v40 = vpop.f32.mrb[5].mxu0 }
 0x356   : > { %v937_v42 = vmul.f32 %v934_v37, %v925_v40  ;;  %v927_v43 = vpop.f32.mrb[6].mxu0 }
 0x357   : > { %v944_v44 = vadd.f32 %v942_v41, %v936_v39  ;;  %v928_v45 = vpop.f32.mrb[7].mxu0 }
 0x358   : > { %v945_v46 = vadd.f32 %v942_v41, %v937_v42 }
 0x359   : > { %v946_v47 = vadd.f32 %v944_v44, %v1311_v13 }
 0x35a   : > { %v947_v48 = vadd.f32 %v945_v46, %v1309_v12 }
 0x35b   : > { %v948_v49 = vmax.f32 %v946_v47, 0.0 }
 0x35c   : > { %v949_v50 = vmax.f32 %v947_v48, 0.0 }
 0x35d   : > { %950 = vst [vmem:[%s379_s13] sm:$0xff] %v948_v49 }
 0x35e   : > { %951 = vst [vmem:[%s379_s13 + $0x8] sm:$0xff] %v949_v50 }
 0x35f   : > { %1116 = shalt.err (!%p1113_p3)
}
 0x360   : > { %s1117_s29 = scalar_lea.hbm %s1434_s16, 256  ;;  %s1121_s26 = scalar_lea.hbm %s1487_s11, 512 }
 0x361   : > { %p1118_p4 = scmp.ne.s32.totalorder %s1434_s16, %s1117_s29  ;;  %p1122_p9 = scmp.lt.u32.totalorder %s1434_s16, %s1487_s11 }
 0x362   : > { %p1123_p10 = scmp.lt.u32.totalorder %s1121_s26, %s1117_s29  ;;  %p1125_p12 = scmp.lt.u32.totalorder %s1117_s29, %s1434_s16 }
 0x363   : > { %p1119_p7 = pnand %p1118_p4, %p1276_p5 }
 0x364   : > { %p1124_p11 = por %p1123_p10, %p1122_p9 }
 0x365   : > { %p1120_p8 = pneg %p1119_p7 }
 0x366   : > { %p1126_p13 = por %p1125_p12, %p1124_p11 }
 0x368   : > { %p1127_p0 = pnand %p1126_p13, %p1120_p8 }
 0x36a   : > { %1130 = shalt.err (!%p1127_p0)
}
 0x36b   : > { %1048 = dma.vmem_to_hbm [thread:$0]  (%p1276_p5), %s1436_s14, 256, %s1434_s16, %s953_s22  }
 0x36c PF: > { %p1054_p1 = scmp.ge.s32.totalorder %s1165_s20, 2  ;;  %s979_s21 = sand.u32 1, %s1153_s17  }
 0x36d   : > { %s980_s25 = scalar_lea.sflag [#allocation5], %s979_s21 }
 0x36e   : > { %p1051_p2 = pnand %p1054_p1, %p1280_p6 }
 0x370   : > { %1148 = dma.done.wait (!%p1051_p2), %s980_s25, 256  }
 0x371   : > { %1150 = vsyncadd (!%p1051_p2), %s980_s25, 4294967040  ;;  %s1491_s30 = sld [smem:[#allocation7_spill]]  ;;  %p21_p3 = scmp.ge.s32.totalorder %s1263_s23, 4  }
 0x372   : > { %s1492_s17 = smov %s1157_s18  ;;  %s1493_s18 = smov %s1161_s19 }
 0x373   : > { %s1495_s20 = smov %s1263_s23  ;;  %23 = sbr.rel (!%p21_p3) target bundleno = 3 (0x3), region = 99 }
 0x377   : > { %s1494_s19 = smov %s1491_s30 }
 0x37a   :  { %985 = vsyncpa [#allocation5], 1 }
 0x37b   :  { %987 = vsyncpa [#allocation5 + $0x1], 1 }

</bundles_post_ra>
